<compile_context>
chip_gen: v7x
topology: tpu7x:2x2x1
jax: 0.10.0
libtpu: 0.0.40
codegen_flags: <defaults>
</compile_context>

<pallas_src>
import functools

import jax
import jax.numpy as jnp
from jax import lax
from jax.experimental import pallas as pl
from jax.experimental.pallas import tpu as pltpu


def _round_up(x, m):
    return ((x + m - 1) // m) * m


def _vmem_limit_bytes():
    """Generation-aware scoped-VMEM limit (~64 MiB v5e/v6e, ~48 MiB v7x)."""
    cap = None
    try:
        info = pltpu.get_tpu_info()
        for attr in ("vmem_capacity_bytes", "vmem_bytes", "vmem_size_bytes"):
            v = getattr(info, attr, None)
            if v:
                cap = int(v)
                break
    except Exception:
        cap = None
    if cap is None:
        try:
            kind = jax.devices()[0].device_kind.lower()
            cap = (64 << 20) if ("v7" in kind or "7x" in kind) else (128 << 20)
        except Exception:
            cap = 64 << 20  # conservative: v7x physical VMEM
    return min(64 << 20, (cap * 3) // 4)


def _pick_tiles(b, n, feat, c, in_itemsize, out_itemsize, budget_bytes,
                n_tile=None, b_tile=None):
    """Choose (Bt, Nt) from a real per-step VMEM footprint model."""
    n8 = _round_up(n, 8)

    def per_elem(nt_):
        # Per-batch-element, per-step VMEM footprint (bytes).
        return (2 * nt_ * feat * in_itemsize            # double-buffered x tile
                + 3 * nt_ * c * 4                       # logits / exp / softmax temps (f32)
                + c * max(feat, 128) * 4                # f32 accumulator (lane padded)
                + 8 * 128 * 4                           # f32 den scratch: (1,C) pads to (8,128)
                + 2 * c * max(feat, 128) * out_itemsize)  # double-buffered output block

    # Resident W^T block (+ second pipeline buffer) and the bias block.
    fixed = 2 * _round_up(feat, 8) * max(c, 128) * in_itemsize + 8 * 128 * 4
    budget = max(budget_bytes - fixed, per_elem(8))

    if n_tile is not None:
        nt = max(8, _round_up(n_tile, 8))
    else:
        cap = 2048                                      # review: raise the Nt cap
        if n % 8 == 0 and n <= cap:
            nt = n
        else:
            # Prefer a large divisor of n (no padding copy) when one exists.
            best = 0
            for d in range(8, min(cap, n) + 1, 8):
                if n % d == 0:
                    best = d
            nt = best if best >= min(512, n8) else min(cap, n8)
        # Shrink Nt until a Bt=1 step fits the budget.
        while nt > 8 and per_elem(nt) > budget:
            nt = max(8, _round_up(nt // 2, 8))

    if b_tile is not None:
        bt = max(1, min(b_tile, b))
        while b % bt != 0:
            bt -= 1
    else:
        cap_bt = max(1, budget // per_elem(nt))
        bt = 1
        for d in range(1, b + 1):
            # Keep grid[0] >= 2 when B >= 2 so the "parallel" batch axis can
            # shard across v7x's two TensorCores (no effect on v5e/v6e).
            if b % d == 0 and d <= cap_bt and (b < 2 or b // d >= 2):
                bt = d
    return bt, nt


def _netrvlad_kernel(x_ref, wt_ref, b_ref, out_ref, acc_ref, den_ref,
                     *, n_actual, mask_rows):
    # x_ref:   (Bt, Nt, F)   input tile (streamed over the N reduction axis)
    # wt_ref:  (F, C)        assignment weights, transposed (resident block)
    # b_ref:   (1, C)        assignment bias (f32)
    # out_ref: (Bt, C, F)    output block (written once, at the last N step)
    # acc_ref: (Bt, C, F)    f32 accumulator: sum_n a[b,n,c] * x[b,n,f]
    # den_ref: (Bt, 1, C)    f32 accumulator: sum_n a[b,n,c]   (lane-major)
    k = pl.program_id(1)

    @pl.when(k == 0)
    def _init():
        acc_ref[...] = jnp.zeros_like(acc_ref)
        den_ref[...] = jnp.zeros_like(den_ref)

    x = x_ref[...]                                     # (Bt, Nt, F), matmul dtype
    bt, nt, f = x.shape
    c = wt_ref.shape[1]

    # --- assignment logits: one tall (Bt*Nt, F) x (F, C) MXU matmul ----------
    logits = jnp.dot(x.reshape(bt * nt, f), wt_ref[...],
                     preferred_element_type=jnp.float32)
    logits = logits + b_ref[...]                       # (Bt*Nt, C), f32

    # --- softmax over clusters; per-step reciprocal stays on the EUP ---------
    m = jnp.max(logits, axis=-1, keepdims=True)
    e = jnp.exp(logits - m)
    a = e * pl.reciprocal(jnp.sum(e, axis=-1, keepdims=True), approx=True)
    a = a.reshape(bt, nt, c)                           # (Bt, Nt, C), f32

    if mask_rows:
        # Zero the assignments of rows that only exist because of N padding.
        row = k * nt + lax.broadcasted_iota(jnp.int32, (1, nt, 1), 1)
        a = jnp.where(row < n_actual, a, 0.0)

    # --- per-cluster mass on the VPU (no N=1 MXU matmul per step) ------------
    den_ref[...] += jnp.sum(a, axis=1, keepdims=True)          # (Bt, 1, C) f32

    # --- aggregation: acc[b,c,f] += sum_n a[b,n,c] * x[b,n,f] ----------------
    a3 = a.astype(x.dtype)          # feed the MXU at input precision, f32 accum
    acc_ref[...] += lax.dot_general(
        a3, x,
        dimension_numbers=(((1,), (1,)), ((0,), (0,))),
        preferred_element_type=jnp.float32)

    # --- finalize: normalize once per batch tile, single block store ---------
    @pl.when(k == pl.num_programs(1) - 1)
    def _finalize():
        bt_ = den_ref.shape[0]
        # The single lane->sublane C-transpose of the (Bt,1,C) mass into
        # (Bt,C,1), expressed as a degenerate K=1 batched dot (== swapaxes);
        # it runs once per batch tile on a well-trodden lowering path.
        den_col = lax.dot_general(
            den_ref[...], jnp.ones((bt_, 1, 1), jnp.float32),
            dimension_numbers=(((1,), (1,)), ((0,), (0,))),
            preferred_element_type=jnp.float32)                 # (Bt, C, 1)
        # Exact divide: finalize touches only Bt*C*F values once, so the
        # non-approx normalization is performance-free (review item).
        out_ref[...] = (acc_ref[...] / den_col).astype(out_ref.dtype)
        # NOTE: one (Bt,C,F) block store replaces the previous C-way unrolled
        # lane-offset stores; the flatten to (..., C*F) is a free row-major
        # reshape in the wrapper (lane-dense whenever F % 128 == 0).


def _netrvlad_pallas(x, weight, bias, nb_cluster, *, matmul_dtype=None,
                     n_tile=None, b_tile=None):
    """x: (B, N, F); weight: (C, F) [PyTorch Linear layout]; bias: (C,)."""
    b, n, feat = x.shape
    c = nb_cluster
    out_dtype = x.dtype

    # Optional reduced-precision MXU feeding (recommended: bf16 on v5e/v6e when
    # the model tolerates it): halves the HBM x stream and runs the MXU at
    # native bf16 rate; accumulation stays f32.
    if matmul_dtype is not None and jnp.dtype(matmul_dtype) != x.dtype:
        x = x.astype(matmul_dtype)
    wt = weight.T.astype(x.dtype)                      # (F, C), resident block
    b2 = bias.reshape(1, c).astype(jnp.float32)        # (1, C)

    vmem_limit = _vmem_limit_bytes()
    budget = (vmem_limit * 7) // 10
    bt, nt = _pick_tiles(b, n, feat, c,
                         jnp.dtype(x.dtype).itemsize,
                         jnp.dtype(out_dtype).itemsize,
                         budget, n_tile=n_tile, b_tile=b_tile)

    n_pad = _round_up(n, nt)
    mask_rows = n_pad != n
    if mask_rows:
        x = jnp.pad(x, ((0, 0), (0, n_pad - n), (0, 0)))

    grid = (b // bt, n_pad // nt)
    kernel = functools.partial(_netrvlad_kernel, n_actual=n, mask_rows=mask_rows)

    # NOTE: on v5e (lowest HBM BW, small C) `pipeline_mode=pl.Buffered(3)` on
    # the x spec can hide more DMA jitter; left at the default depth to keep
    # VMEM headroom on v7x.
    out = pl.pallas_call(
        kernel,
        out_shape=jax.ShapeDtypeStruct((b, c, feat), out_dtype),
        grid_spec=pltpu.PrefetchScalarGridSpec(
            num_scalar_prefetch=0,
            grid=grid,
            in_specs=[
                pl.BlockSpec((bt, nt, feat), lambda i, k: (i, k, 0)),
                pl.BlockSpec((feat, c), lambda i, k: (0, 0)),
                pl.BlockSpec((1, c), lambda i, k: (0, 0)),
            ],
            out_specs=pl.BlockSpec((bt, c, feat), lambda i, k: (i, 0, 0)),
            scratch_shapes=[
                pltpu.VMEM((bt, c, feat), jnp.float32),   # sum_n a*x
                pltpu.VMEM((bt, 1, c), jnp.float32),      # sum_n a (lane-major)
            ],
        ),
        compiler_params=pltpu.CompilerParams(
            dimension_semantics=("parallel", "arbitrary"),
            vmem_limit_bytes=vmem_limit),
    )(x, wt, b2)
    return out.reshape(b, c * feat)


def netrvlad(x, weight, bias, nb_cluster, dim=1, flatten=True, *,
             matmul_dtype=None, n_tile=None, b_tile=None):
    """NetRVLAD forward matching the PyTorch module (any rank, any `dim`)."""
    feat = x.shape[-1]
    xm = jnp.moveaxis(x, dim, -2)                      # (..., N, F)
    lead = xm.shape[:-2]
    n = xm.shape[-2]
    xb = xm.reshape((-1, n, feat))                     # collapse leading dims
    flat = _netrvlad_pallas(xb, weight, bias, nb_cluster,
                            matmul_dtype=matmul_dtype,
                            n_tile=n_tile, b_tile=b_tile)   # (prod(lead), C*F)
    if flatten:
        return flat.reshape(*lead, nb_cluster * feat)
    return flat.reshape(*lead, nb_cluster, feat)


def netrvlad_reference(x, weight, bias, nb_cluster, dim=1, flatten=True):
    """Plain-JAX reference mirroring the PyTorch forward."""
    feat = x.shape[-1]
    xm = jnp.moveaxis(x, dim, -2)
    logits = jnp.einsum("...nf,cf->...nc", xm, weight) + bias
    a = jax.nn.softmax(logits, axis=-1)
    a_x = jnp.einsum("...nc,...nf->...cf", a, xm)
    out = a_x / jnp.sum(a, axis=-2)[..., None]
    if flatten:
        out = out.reshape(*out.shape[:-2], nb_cluster * feat)
    return out


if __name__ == "__main__":
    key = jax.random.PRNGKey(0)

    def make_params(kw, kb, feat, c):
        bound = 1.0 / (feat ** 0.5)
        w = jax.random.uniform(kw, (c, feat), minval=-bound, maxval=bound,
                               dtype=jnp.float32)
        bv = jax.random.uniform(kb, (c,), minval=-bound, maxval=bound,
                                dtype=jnp.float32)
        return w, bv

    # Only the per-step softmax reciprocal is approximate now (the final
    # normalization uses an exact divide), so the tolerance is tighter than
    # the previous 2e-2.
    TOL = dict(atol=1e-2, rtol=1e-2)

    # Test 1: basic 3-D input (dim=1, moveaxis is a no-op): B=2, N=16, F=32, C=8.
    B, N, F, C = 2, 16, 32, 8
    k1, k2, k3, key = jax.random.split(key, 4)
    x = jax.random.normal(k1, (B, N, F), dtype=jnp.float32)
    w, bv = make_params(k2, k3, F, C)
    out = jax.block_until_ready(netrvlad(x, w, bv, C, dim=1, flatten=True))
    ref = netrvlad_reference(x, w, bv, C, dim=1, flatten=True)
    assert out.shape == (B, C * F), out.shape
    assert jnp.allclose(out, ref, **TOL), float(jnp.max(jnp.abs(out - ref)))

    # Test 2: 4-D input pooled over dim=2 with ragged N=25 — exercises the
    # leading-dim collapse (batch 6, Bt=3, grid[0]=2) and N padding + masking.
    B0, B1, N2, F2, C2 = 2, 3, 25, 32, 8
    k1, k2, k3, key = jax.random.split(key, 4)
    x2 = jax.random.normal(k1, (B0, B1, N2, F2), dtype=jnp.float32)
    w2, bv2 = make_params(k2, k3, F2, C2)
    out2 = jax.block_until_ready(netrvlad(x2, w2, bv2, C2, dim=2, flatten=True))
    ref2 = netrvlad_reference(x2, w2, bv2, C2, dim=2, flatten=True)
    assert out2.shape == (B0, B1, C2 * F2), out2.shape
    assert jnp.allclose(out2, ref2, **TOL), float(jnp.max(jnp.abs(out2 - ref2)))

    # Test 3: forced small N tile — exercises the multi-step N reduction with
    # the VMEM accumulators plus masking of the final padded block
    # (N=20, Nt=8 -> 3 reduction steps, last block half-padded).
    B3, N3, F3, C3 = 2, 20, 32, 8
    k1, k2, k3, key = jax.random.split(key, 4)
    x3 = jax.random.normal(k1, (B3, N3, F3), dtype=jnp.float32)
    w3, bv3 = make_params(k2, k3, F3, C3)
    out3 = jax.block_until_ready(
        netrvlad(x3, w3, bv3, C3, dim=1, flatten=True, n_tile=8))
    ref3 = netrvlad_reference(x3, w3, bv3, C3, dim=1, flatten=True)
    assert out3.shape == (B3, C3 * F3), out3.shape
    assert jnp.allclose(out3, ref3, **TOL), float(jnp.max(jnp.abs(out3 - ref3)))

    print("KERNEL_OK")
</pallas_src>

<mosaic_0001>
module attributes {stable_mosaic.version = 11 : i64} {
  func.func @_netrvlad_kernel(%arg0: i32, %arg1: i32, %arg2: memref<1x16x32xf32, #tpu.memory_space<vmem>>, %arg3: memref<32x8xf32, #tpu.memory_space<vmem>>, %arg4: memref<1x8xf32, #tpu.memory_space<vmem>>, %arg5: memref<1x8x32xf32, #tpu.memory_space<vmem>>, %arg6: memref<1x8x32xf32, #tpu.memory_space<vmem>>, %arg7: memref<1x1x8xf32, #tpu.memory_space<vmem>>) attributes {dimension_semantics = [#tpu.dimension_semantics<parallel>, #tpu.dimension_semantics<arbitrary>], iteration_bounds = array<i64: 2, 1>, scalar_prefetch = 0 : i64, scratch_operands = 2 : i64, tpu.core_type = #tpu.core_type<tc>, window_params = [{transform_indices = @transform_0, window_bounds = array<i64: 1, 16, 32>}, {pipeline_mode = #tpu.pipeline_mode<synchronous>, transform_indices = @transform_1, window_bounds = array<i64: 32, 8>}, {pipeline_mode = #tpu.pipeline_mode<synchronous>, transform_indices = @transform_2, window_bounds = array<i64: 1, 8>}, {transform_indices = @transform_3, window_bounds = array<i64: 1, 8, 32>}]} {
    %c0_i32 = arith.constant 0 : i32
    %0 = arith.cmpi eq, %arg1, %c0_i32 : i32
    %1 = arith.extui %0 : i1 to i32
    %c0_i32_0 = arith.constant 0 : i32
    %2 = arith.cmpi ne, %1, %c0_i32_0 : i32
    scf.if %2 {
      %cst_25 = arith.constant 0.000000e+00 : f32
      %33 = vector.broadcast %cst_25 : f32 to vector<1x8x32xf32>
      %c0_26 = arith.constant 0 : index
      %c0_27 = arith.constant 0 : index
      %c0_28 = arith.constant 0 : index
      %34 = vector.load %arg6[%c0_26, %c0_27, %c0_28] : memref<1x8x32xf32, #tpu.memory_space<vmem>>, vector<1x8x32xf32>
      tpu.vector_store %arg6[%c0_26, %c0_27, %c0_28], %33 {strides = array<i32>} : memref<1x8x32xf32, #tpu.memory_space<vmem>>, vector<1x8x32xf32>,
      %cst_29 = arith.constant 0.000000e+00 : f32
      %35 = vector.broadcast %cst_29 : f32 to vector<1x1x8xf32>
      %c0_30 = arith.constant 0 : index
      %c0_31 = arith.constant 0 : index
      %c0_32 = arith.constant 0 : index
      %36 = vector.load %arg7[%c0_30, %c0_31, %c0_32] : memref<1x1x8xf32, #tpu.memory_space<vmem>>, vector<1x1x8xf32>
      tpu.vector_store %arg7[%c0_30, %c0_31, %c0_32], %35 {strides = array<i32>} : memref<1x1x8xf32, #tpu.memory_space<vmem>>, vector<1x1x8xf32>,
    } else {
    }
    %c0 = arith.constant 0 : index
    %c0_1 = arith.constant 0 : index
    %c0_2 = arith.constant 0 : index
    %3 = vector.load %arg2[%c0, %c0_1, %c0_2] : memref<1x16x32xf32, #tpu.memory_space<vmem>>, vector<1x16x32xf32>
    %4 = vector.shape_cast %3 : vector<1x16x32xf32> to vector<16x32xf32>
    %c0_3 = arith.constant 0 : index
    %c0_4 = arith.constant 0 : index
    %5 = vector.load %arg3[%c0_3, %c0_4] : memref<32x8xf32, #tpu.memory_space<vmem>>, vector<32x8xf32>
    %cst = arith.constant dense<0.000000e+00> : vector<16x8xf32>
    %6 = tpu.matmul %4, %5, %cst {dimension_numbers = #tpu.dot_dimension_numbers<[1], [0], [0], [1], [0, 0, 1, 1], [], []>} : vector<16x32xf32>, vector<32x8xf32>, vector<16x8xf32> -> vector<16x8xf32>
    %c0_5 = arith.constant 0 : index
    %c0_6 = arith.constant 0 : index
    %7 = vector.load %arg4[%c0_5, %c0_6] : memref<1x8xf32, #tpu.memory_space<vmem>>, vector<1x8xf32>
    %8 = vector.broadcast %7 : vector<1x8xf32> to vector<16x8xf32>
    %9 = arith.addf %6, %8 : vector<16x8xf32>
    %cst_7 = arith.constant dense<0xFF800000> : vector<16xf32>
    %10 = vector.multi_reduction <maximumf>, %9, %cst_7 [1] : vector<16x8xf32> to vector<16xf32>
    %11 = vector.shape_cast %10 : vector<16xf32> to vector<16x1xf32>
    %12 = vector.broadcast %11 : vector<16x1xf32> to vector<16x8xf32>
    %13 = arith.subf %9, %12 : vector<16x8xf32>
    %14 = math.exp %13 : vector<16x8xf32>
    %cst_8 = arith.constant dense<0.000000e+00> : vector<16xf32>
    %15 = vector.multi_reduction <add>, %14, %cst_8 [1] : vector<16x8xf32> to vector<16xf32>
    %16 = vector.shape_cast %15 : vector<16xf32> to vector<16x1xf32>
    %17 = tpu.reciprocal %16 {approx = true} : vector<16x1xf32> -> vector<16x1xf32>
    %18 = vector.broadcast %17 : vector<16x1xf32> to vector<16x8xf32>
    %19 = arith.mulf %14, %18 : vector<16x8xf32>
    %20 = vector.shape_cast %19 : vector<16x8xf32> to vector<1x16x8xf32>
    %c0_9 = arith.constant 0 : index
    %c0_10 = arith.constant 0 : index
    %c0_11 = arith.constant 0 : index
    %21 = vector.load %arg7[%c0_9, %c0_10, %c0_11] : memref<1x1x8xf32, #tpu.memory_space<vmem>>, vector<1x1x8xf32>
    %cst_12 = arith.constant dense<0.000000e+00> : vector<1x8xf32>
    %22 = vector.multi_reduction <add>, %20, %cst_12 [1] : vector<1x16x8xf32> to vector<1x8xf32>
    %23 = vector.shape_cast %22 : vector<1x8xf32> to vector<1x1x8xf32>
    %24 = arith.addf %21, %23 : vector<1x1x8xf32>
    %c0_13 = arith.constant 0 : index
    %c0_14 = arith.constant 0 : index
    %c0_15 = arith.constant 0 : index
    %25 = vector.load %arg7[%c0_13, %c0_14, %c0_15] : memref<1x1x8xf32, #tpu.memory_space<vmem>>, vector<1x1x8xf32>
    tpu.vector_store %arg7[%c0_13, %c0_14, %c0_15], %24 {strides = array<i32>} : memref<1x1x8xf32, #tpu.memory_space<vmem>>, vector<1x1x8xf32>,
    %c0_16 = arith.constant 0 : index
    %c0_17 = arith.constant 0 : index
    %c0_18 = arith.constant 0 : index
    %26 = vector.load %arg6[%c0_16, %c0_17, %c0_18] : memref<1x8x32xf32, #tpu.memory_space<vmem>>, vector<1x8x32xf32>
    %cst_19 = arith.constant dense<0.000000e+00> : vector<1x8x32xf32>
    %27 = tpu.matmul %20, %3, %cst_19 {dimension_numbers = #tpu.dot_dimension_numbers<[1], [1], [2], [2], [0, 0, 0, 2, 1, 2], [0], [0]>} : vector<1x16x8xf32>, vector<1x16x32xf32>, vector<1x8x32xf32> -> vector<1x8x32xf32>
    %28 = arith.addf %26, %27 : vector<1x8x32xf32>
    %c0_20 = arith.constant 0 : index
    %c0_21 = arith.constant 0 : index
    %c0_22 = arith.constant 0 : index
    %29 = vector.load %arg6[%c0_20, %c0_21, %c0_22] : memref<1x8x32xf32, #tpu.memory_space<vmem>>, vector<1x8x32xf32>
    tpu.vector_store %arg6[%c0_20, %c0_21, %c0_22], %28 {strides = array<i32>} : memref<1x8x32xf32, #tpu.memory_space<vmem>>, vector<1x8x32xf32>,
    %c0_i32_23 = arith.constant 0 : i32
    %30 = arith.cmpi eq, %arg1, %c0_i32_23 : i32
    %31 = arith.extui %30 : i1 to i32
    %c0_i32_24 = arith.constant 0 : i32
    %32 = arith.cmpi ne, %31, %c0_i32_24 : i32
    scf.if %32 {
      %c0_25 = arith.constant 0 : index
      %c0_26 = arith.constant 0 : index
      %c0_27 = arith.constant 0 : index
      %33 = vector.load %arg7[%c0_25, %c0_26, %c0_27] : memref<1x1x8xf32, #tpu.memory_space<vmem>>, vector<1x1x8xf32>
      %cst_28 = arith.constant 1.000000e+00 : f32
      %34 = vector.broadcast %cst_28 : f32 to vector<1x1x1xf32>
      %cst_29 = arith.constant dense<0.000000e+00> : vector<1x8x1xf32>
      %35 = tpu.matmul %33, %34, %cst_29 {dimension_numbers = #tpu.dot_dimension_numbers<[1], [1], [2], [2], [0, 0, 0, 2, 1, 2], [0], [0]>} : vector<1x1x8xf32>, vector<1x1x1xf32>, vector<1x8x1xf32> -> vector<1x8x1xf32>
      %c0_30 = arith.constant 0 : index
      %c0_31 = arith.constant 0 : index
      %c0_32 = arith.constant 0 : index
      %36 = vector.load %arg6[%c0_30, %c0_31, %c0_32] : memref<1x8x32xf32, #tpu.memory_space<vmem>>, vector<1x8x32xf32>
      %37 = vector.broadcast %35 : vector<1x8x1xf32> to vector<1x8x32xf32>
      %38 = arith.divf %36, %37 : vector<1x8x32xf32>
      %c0_33 = arith.constant 0 : index
      %c0_34 = arith.constant 0 : index
      %c0_35 = arith.constant 0 : index
      %39 = vector.load %arg5[%c0_33, %c0_34, %c0_35] : memref<1x8x32xf32, #tpu.memory_space<vmem>>, vector<1x8x32xf32>
      tpu.vector_store %arg5[%c0_33, %c0_34, %c0_35], %38 {strides = array<i32>} : memref<1x8x32xf32, #tpu.memory_space<vmem>>, vector<1x8x32xf32>,
    } else {
    }
    return
  }
  func.func @transform_0(%arg0: i32, %arg1: i32) -> (i32, i32, i32) {
    %c0_i32 = arith.constant 0 : i32
    %c0_i32_0 = arith.constant 0 : i32
    return %arg0, %arg1, %c0_i32 : i32, i32, i32
  }
  func.func @transform_1(%arg0: i32, %arg1: i32) -> (i32, i32) {
    %c0_i32 = arith.constant 0 : i32
    %c0_i32_0 = arith.constant 0 : i32
    %c0_i32_1 = arith.constant 0 : i32
    return %c0_i32, %c0_i32_0 : i32, i32
  }
  func.func @transform_2(%arg0: i32, %arg1: i32) -> (i32, i32) {
    %c0_i32 = arith.constant 0 : i32
    %c0_i32_0 = arith.constant 0 : i32
    %c0_i32_1 = arith.constant 0 : i32
    return %c0_i32, %c0_i32_0 : i32, i32
  }
  func.func @transform_3(%arg0: i32, %arg1: i32) -> (i32, i32, i32) {
    %c0_i32 = arith.constant 0 : i32
    %c0_i32_0 = arith.constant 0 : i32
    %c0_i32_1 = arith.constant 0 : i32
    return %arg0, %c0_i32, %c0_i32_0 : i32, i32, i32
  }
}

</mosaic_0001>

<bundles_post_ra>
// kernel: tpu_custom_call.1
= control target key start
LH: loop header
LB: loop body
LE: loop exit
PB: predicated region body
PF: predicated region fallthrough
CT: control target
= control target key end

     0   :  { %8 = vsyncpa [#allocation5], 0  ;;  %s1375_s0 = inlined_call_operand.hbm [shape: f32[2,16,32], index: 0, kind: input, shape index: {}]   ;;  %s1376_s1 = inlined_call_operand.hbm [shape: f32[32,8], index: 1, kind: input, shape index: {}]   ;;  %s1377_s2 = inlined_call_operand.hbm [shape: f32[1,8], index: 2, kind: input, shape index: {}]   ;;  %s1378_s3 = inlined_call_operand.hbm [shape: f32[2,8,32], index: 3, kind: output, shape index: {}]  }
   0x1   :  { %10 = vsyncpa [#allocation5 + $0x1], 0 }
   0x2   :  { %11 = vsyncpa [#allocation8], 0 }
   0x3   :  { %12 = vsyncpa [#allocation6], 0 }
   0x4   :  { %14 = vsyncpa [#allocation6 + $0x1], 0  ;;  %s1094_s12 = smov 0   ;;  %s1096_s13 = smov 0  }
   0x5   :  { %s1098_s14 = smov 0   ;;  %s1100_s15 = smov 0  }
   0x6   :  { %s1102_s16 = smov 0   ;;  %s1104_s17 = smov 0  }
   0x7 LB: > { %s718_s18 = sadd.s32 4294967295, %s1061_s17   ;;  %s719_s19 = sadd.s32 4294967294, %s1061_s17   ;;  %s1061_s17 = sphi %s1104_s17, %s20_s17   ;;  %s1057_s16 = sphi %s1102_s16, %s1400_s16   ;;  %s1053_s15 = sphi %s1100_s15, %s1399_s15   ;;  %s1049_s14 = sphi %s1098_s14, %s1398_s14   ;;  %s1045_s13 = sphi %s1096_s13, %s1397_s13   ;;  %s1041_s12 = sphi %s1094_s12, %s1396_s12  }
   0x8   : > { %p54_p0 = scmp.ne.s32.totalorder %s1045_s13, %s1041_s12  ;;  %p1128_p1 = scmp.eq.s32.totalorder %s718_s18, 0 }
   0x9   : > { %p1132_p2 = scmp.eq.s32.totalorder %s718_s18, 1  ;;  %p126_p3 = scmp.eq.s32.totalorder %s719_s19, 1 }
   0xa   : > { %s1383_s20 = scalar_select %p1128_p1, 1, 0 }
   0xb   : > { %p1138_p4 = por %p1128_p1, %p54_p0  ;;  %p720_p5 = scmp.ge.s32.totalorder %s1061_s17, 1 }
   0xc   : > { %p1143_p6 = por %p126_p3, %p54_p0  ;;  %p133_p7 = scmp.lt.s32.totalorder %s1061_s17, 3 }
   0xd   : > { %s1385_s22 = scalar_select %p1138_p4, 1, 0 }
   0xe   : > { %s1386_s23 = scalar_select %p1143_p6, 1, 0 }
   0xf   : > { %p1148_p8 = pnand %p720_p5, %p133_p7  ;;  %s1063_s25 = smov [#allocation7]  }
  0x10   : > { %s145_s26 = sshll.u32 %s1063_s25, 4  ;;  %s1064_s28 = smov [#allocation9]   ;;  %s1152_s26 = int_to_ptr.vmem [resolvable:$true] %s145_s26 }
  0x11   : > { %p800_p9 = pneg %p1148_p8  ;;  %s159_s29 = sshll.u32 %s1064_s28, 4  ;;  %s1163_s29 = int_to_ptr.vmem [resolvable:$true] %s159_s29 }
  0x12   : > { %s889_s5 = scalar_lea.hbm %s1376_s1, 512 }
  0x13   : > { %p1159_p11 = pnand %p800_p9, %p1128_p1  ;;  %p890_p12 = scmp.ne.s32.totalorder %s1376_s1, %s889_s5 }
  0x14   : > { %p896_p5 = scmp.lt.u32.totalorder %s889_s5, %s1376_s1 }
  0x15   : > { %p891_p13 = pneg %p1159_p11 }
  0x17   : > { %p892_p0 = pnand %p891_p13, %p890_p12 }
  0x19   : > { %p893_p3 = pneg %p892_p0 }
  0x1b   : > { %p898_p7 = pnand %p896_p5, %p893_p3 }
  0x1d   : > { %901 = shalt.err (!%p898_p7)
}
  0x1e   : > { %s902_s10 = scalar_lea.vmem %s1152_s26, 512  ;;  %p910_p1 = scmp.lt.s32.totalorder %s1152_s26, %s1152_s26 }
  0x1f   : > { %p903_p9 = scmp.ne.s32.totalorder %s1152_s26, %s902_s10  ;;  %p911_p12 = scmp.lt.s32.totalorder %s902_s10, %s902_s10 }
  0x21   : > { %p905_p10 = pnand %p903_p9, %p891_p13  ;;  %p912_p0 = por %p911_p12, %p910_p1 }
  0x23   : > { %p906_p6 = pneg %p905_p10 }
  0x25   : > { %p913_p4 = pnand %p912_p0, %p906_p6 }
  0x27   : > { %916 = shalt.err (!%p913_p4)
}
  0x28   : > { %s1065_s11 = smov 128   ;;  %s1066_s18 = smov 8  }
  0x29   : > { %803 = dma.hbm_to_vmem [thread:$0]  (!%p1159_p11), %s1376_s1, 512, %s1152_s26, [#allocation8], %s1065_s11, %s1065_s11, %s1066_s18  }
  0x2a   : > { %s917_s4 = scalar_lea.hbm %s1377_s2, 16 }
  0x2b   : > { %p918_p1 = scmp.ne.s32.totalorder %s1377_s2, %s917_s4  ;;  %p924_p10 = scmp.lt.u32.totalorder %s917_s4, %s1377_s2 }
  0x2d   : > { %p920_p4 = pnand %p918_p1, %p891_p13 }
  0x2f   : > { %p921_p6 = pneg %p920_p4 }
  0x31   : > { %p926_p3 = pnand %p924_p10, %p921_p6 }
  0x33   : > { %929 = shalt.err (!%p926_p3)
}
  0x34   : > { %s930_s26 = scalar_lea.vmem %s1163_s29, 16  ;;  %s937_s9 = scalar_lea.vmem %s1163_s29, 32 }
  0x35   : > { %p931_p5 = scmp.ne.s32.totalorder %s1163_s29, %s930_s26  ;;  %p938_p12 = scmp.lt.s32.totalorder %s1163_s29, %s1163_s29 }
  0x36   : > { %p939_p0 = scmp.lt.s32.totalorder %s937_s9, %s930_s26 }
  0x37   : > { %p933_p7 = pnand %p931_p5, %p891_p13 }
  0x38   : > { %p940_p1 = por %p939_p0, %p938_p12 }
  0x39   : > { %p934_p9 = pneg %p933_p7 }
  0x3b   : > { %p941_p4 = pnand %p940_p1, %p934_p9 }
  0x3d   : > { %944 = shalt.err (!%p941_p4)
}
  0x3e   : > { %806 = dma.hbm_to_vmem [thread:$0]  (!%p1159_p11), %s1377_s2, 16, %s1163_s29, [#allocation8]  }
  0x3f   : > { %s32_s25 = sadd.s32 1, %s1057_s16  ;;  %s41_s28 = sadd.s32 1, %s1049_s14 }
  0x40   : > { %p34_p13 = scmp.ge.s32.totalorder %s32_s25, 2  ;;  %p48_p6 = scmp.ne.s32.totalorder %s1049_s14, %s1045_s13 }
  0x41   : > { %p49_p10 = scmp.eq.s32.totalorder %s1061_s17, 0  ;;  %p817_p3 = scmp.lt.s32.totalorder %s1061_s17, 2 }
  0x42   : > { %s1402_s25 = smov (%p34_p13, %s32_s25), 0  ;;  %p1231_p7 = por %p1132_p2, %p48_p6 }
  0x43   : > { %p50_p5 = por %p49_p10, %p48_p6  ;;  %s36_s30 = ssub.s32 %s1057_s16, %s1402_s25 }
  0x44   : > { %s1389_s27 = scalar_select %p1231_p7, 1, 0 }
  0x45   : > { %s170_s4 = sand.u32 1, %s1049_s14   ;;  %p39_p9 = scmp.eq.s32.totalorder %s36_s30, 0 }
  0x46   : > { %s724_s29 = sshll.u32 %s170_s4, 4  ;;  %s742_s5 = sshll.u32 %s1057_s16, 8 }
  0x47   : > { %s1240_s6 = scalar_select %p39_p9, %s1049_s14, %s41_s28  }
  0x48   : > { %s1245_s26 = scalar_lea.hbm %s1375_s0, %s742_s5  ;;  %s174_s21 = scalar_lea.vmem [#allocation4], %s724_s29 }
  0x49   : > { %s183_s9 = sshll.u32 %s174_s21, 4  ;;  %p1249_p2 = pnand %p817_p3, %p50_p5  ;;  %s1253_s9 = int_to_ptr.vmem [resolvable:$true] %s183_s9 }
  0x4a   : > { %s1255_s19 = scalar_lea.sflag [#allocation5], %s170_s4  ;;  %s945_s28 = scalar_lea.hbm %s1245_s26, 256 }
  0x4b   : > { %p946_p11 = scmp.ne.s32.totalorder %s1245_s26, %s945_s28  ;;  %p947_p12 = pneg %p1249_p2 }
  0x4c   : > { %s950_s5 = scalar_lea.hbm %s1375_s0, 512  ;;  %p951_p4 = scmp.lt.u32.totalorder %s1245_s26, %s1375_s0 }
  0x4d   : > { %p948_p0 = pnand %p947_p12, %p946_p11  ;;  %p952_p13 = scmp.lt.u32.totalorder %s950_s5, %s945_s28 }
  0x4e   : > { %p954_p10 = scmp.lt.u32.totalorder %s945_s28, %s1245_s26 }
  0x4f   : > { %p949_p1 = pneg %p948_p0  ;;  %p953_p6 = por %p952_p13, %p951_p4 }
  0x51   : > { %p955_p3 = por %p954_p10, %p953_p6 }
  0x53   : > { %p956_p5 = pnand %p955_p3, %p949_p1 }
  0x55   : > { %959 = shalt.err (!%p956_p5)
}
  0x56   : > { %s960_s4 = scalar_lea.vmem %s1253_s9, 256  ;;  %s1067_s21 = smov [#allocation4]  }
  0x57   : > { %p961_p9 = scmp.ne.s32.totalorder %s1253_s9, %s960_s4  ;;  %s965_s30 = sshll.u32 %s1067_s21, 4  ;;  %s966_s30 = int_to_ptr.vmem [resolvable:$false] %s965_s30 }
  0x58   : > { %s967_s29 = scalar_lea.vmem %s966_s30, 512  ;;  %p968_p7 = scmp.lt.s32.totalorder %s1253_s9, %s966_s30 }
  0x59   : > { %p963_p11 = pnand %p961_p9, %p947_p12  ;;  %p969_p4 = scmp.lt.s32.totalorder %s967_s29, %s960_s4 }
  0x5b   : > { %p964_p0 = pneg %p963_p11  ;;  %p970_p13 = por %p969_p4, %p968_p7 }
  0x5d   : > { %p971_p6 = pnand %p970_p13, %p964_p0 }
  0x5f   : > { %974 = shalt.err (!%p971_p6)
}
  0x60   : > { %810 = dma.hbm_to_vmem [thread:$0]  (!%p1249_p2), %s1245_s26, 256, %s1253_s9, %s1255_s19, %s1065_s11, %s1065_s11, %s1066_s18  }
  0x61   : > { %195 = sbr.rel (%p1148_p8) target bundleno = 1174 (0x496), region = 32  ;;  %s1289_s28 = sand.u32 (!%p1148_p8), 1, %s1045_s13  }
  0x62   : > { %s728_s5 = sshll.u32 (!%p1148_p8), %s1289_s28, 4  ;;  %s198_s7 = scalar_lea.sflag (!%p1148_p8), [#allocation5], %s1289_s28 }
  0x63   : > { %s201_s8 = scalar_lea.vmem (!%p1148_p8), [#allocation4], %s728_s5  ;;  %p1391_p7 = scmp.ne.s32.totalorder (!%p1148_p8), %s1385_s22, 0 }
  0x68   : > { %1028 = dma.done.wait (%p1391_p7), %s198_s7, 256  }
  0x69   : > { %1030 = vsyncadd (%p1391_p7), %s198_s7, 4294967040  ;;  %p1392_p12 = scmp.ne.s32.totalorder %s1383_s20, 0 }
  0x6b   : > { %1032 = dma.done.wait (%p1392_p12), [#allocation8], 528  }
  0x6c   : > { %1034 = vsyncadd (%p1392_p12), [#allocation8], 4294966768  ;;  %vm237_vm0 = vcmask 261120   ;;  %vm239_vm1 = vcmask 57344   ;;  %v1068_v0 = vmov 0.0   ;;  %v243_v1 = vld [vmem:[#allocation7] sm:$0xff] }
  0x6d   : > { %238 = vst.msk [vmem:[#allocation2] sm:$0xff] %vm237_vm0, %v1068_v0  ;;  %v244_v2 = vld [vmem:[#allocation7 + $0x8] sm:$0xff]  ;;  %v245_v3 = vld [vmem:[#allocation7 + $0x10] sm:$0xff]  ;;  %v246_v5 = vld [vmem:[#allocation7 + $0x18] sm:$0xff]  ;;  %vm336_vm2 = vcmask 64512   ;;  %v1069_v27 = vmov 0.0|0.0  }
  0x6e   : > { %240 = vst.msk [vmem:[#allocation3] sm:$0x1] %vm239_vm1, %v1068_v0  ;;  %v777_v4 = vpack.c.bf16 %v244_v2, %v243_v1  ;;  %v241_v6 = vld [vmem:[%s201_s8] sm:$0xff]  ;;  %v781_v7 = vpack.c.bf16 %v246_v5, %v245_v3  ;;  %v242_v8 = vld [vmem:[%s201_s8 + $0x8] sm:$0xff]  ;;  %785 = vmatprep.subr.bf16.mxu1 %v1069_v27  ;;  %vm1070_vm3 = vmmov 0   ;;  %vm405_vm4 = vcmask 130048  }
  0x6f   : > { %762 = vmatprep.mubr.msk.f32.mxu0 %vm237_vm0, %v241_v6  ;;  %v732_v9 = vld [vmem:[#allocation9] ss:$0 sm:$0xff]  ;;  %v786_v26 = vpack.c.bf16 %v242_v8, %v241_v6  ;;  %769 = vmatprep.mubr.msk.f32.mxu1 %vm1070_vm3, %v1068_v0  ;;  %vm521_vm5 = vcmask 1040384   ;;  %v1071_v47 = vmov 1.0   ;;  %vm517_vm6 = vcmask 7168   ;;  %s731_s20 = sshll.u32 %s1289_s28, 3 }
  0x70   : > { %778 = vmatprep.subr.bf16.mxu0 %v777_v4  ;;  %v1072_v49 = vmov 0   ;;  %s739_s22 = sshll.u32 %s1053_s15, 7  ;;  %s231_s24 = scalar_lea.vmem [#allocation10], %s731_s20 }
  0x71   : > { %780 = vmatpush3.bf16.msra.mxu0 %v777_v4  ;;  %787 = vmatpush3.bf16.msra.mxu1 %v786_v26  ;;  %s618_s11 = sshll.u32 %s231_s24, 4  ;;  %s1325_s9 = scalar_lea.hbm %s1378_s3, %s739_s22  ;;  %s1327_s11 = int_to_ptr.vmem [resolvable:$true] %s618_s11 }
  0x72   : > { %782 = vmatprep.subr.bf16.mxu0 %v781_v7  ;;  %772 = vmatprep.subr.mxu1 %v1068_v0  ;;  %s605_s10 = scalar_lea.sflag [#allocation6], %s1289_s28  ;;  %s975_s19 = scalar_lea.vmem %s1327_s11, 128 }
  0x73   : > { %p976_p8 = scmp.ne.s32.totalorder %s1327_s11, %s975_s19  ;;  %p1393_p2 = scmp.ne.s32.totalorder %s1389_s27, 0 }
  0x74   : > { %v372_v50 = vld [vmem:[#allocation2] sm:$0xff]  ;;  %s1073_s15 = smov [#allocation10]  }
  0x75   : > { %784 = vmatpush3.bf16.msra.mxu0 %v781_v7  ;;  %v359_v42 = vld [vmem:[#allocation3] sm:$0x1]  ;;  %p977_p1 = pnand %p976_p8, %p1393_p2  ;;  %s979_s4 = sshll.u32 %s1073_s15, 4  ;;  %s980_s4 = int_to_ptr.vmem [resolvable:$false] %s979_s4 }
  0x76   : > { %s981_s21 = scalar_lea.vmem %s980_s4, 256  ;;  %p982_p3 = scmp.lt.s32.totalorder %s1327_s11, %s980_s4 }
  0x77   : > { %p978_p10 = pneg %p977_p1  ;;  %p983_p5 = scmp.lt.s32.totalorder %s981_s21, %s975_s19 }
  0x78   : > { %763 = vmatmul.mubr.msk.f32.vlgmr.msra.gmra.mrb[0].mxu0 %vm237_vm0, %v242_v8 }
  0x79   : > { %p984_p9 = por %p983_p5, %p982_p3 }
  0x7b   : > { %p985_p11 = pnand %p984_p9, %p978_p10 }
 0x14b   : > { %v764_v10 = vpop.f32.mrb[0].mxu0 }
 0x14c   : > { %v327_v11 = vpop.f32.mrb[1].mxu0  ;;  %v333_v13 = vadd.f32 %v764_v10, %v732_v9 }
 0x14d   : > { %v328_v12 = vadd.f32 %v732_v9, %v327_v11 }
 0x14e   : > { %v340_v15 = vsel %vm336_vm2, %v333_v13, -inf }
 0x14f   : > { %v337_v14 = vsel %vm336_vm2, %v328_v12, -inf }
 0x150   : > { %338 = vmax.xlane.f32.xlu0 %v337_v14 }
 0x154   : > { %341 = vmax.xlane.f32.xlu0 %v340_v15 }
 0x1dd   : > { %v339_v16 = vpop.xlane.xlu0 %338 }
 0x1de   : > { %v343_v17 = vsub.f32 %v328_v12, %v339_v16 }
 0x1e0   : > { %v345_v18 = vmul.f32 1.442695, %v343_v17 }
 0x1e1   : > { %v342_v19 = vpop.xlane.xlu0 %341 }
 0x1e2   : > { %879 = vpow2.f32 %v345_v18  ;;  %v344_v20 = vsub.f32 %v333_v13, %v342_v19 }
 0x1e4   : > { %v347_v21 = vmul.f32 1.442695, %v344_v20 }
 0x1e6   : > { %881 = vpow2.f32 %v347_v21 }
 0x1ec   : > { %v880_v22 = vpop.eup %879 }
 0x1ed   : > { %v349_v23 = vsel %vm336_vm2, %v880_v22, 0.0 }
 0x1ee   : > { %350 = vadd.xlane.f32.xlu1 %v349_v23 }
 0x1f0   : > { %v882_v24 = vpop.eup %881 }
 0x1f1   : > { %v352_v25 = vsel %vm336_vm2, %v882_v24, 0.0 }
 0x1f2   : > { %353 = vadd.xlane.f32.xlu1 %v352_v25 }
 0x27b   : > { %v351_v28 = vpop.xlane.xlu1 %350 }
 0x27c   : > { %883 = vrcp.f32 %v351_v28 }
 0x27f   : > { %v354_v29 = vpop.xlane.xlu1 %353 }
 0x280   : > { %885 = vrcp.f32 %v354_v29 }
 0x286   : > { %v884_v30 = vpop.eup %883 }
 0x287   : > { %v357_v31 = vmul.f32 %v884_v30, %v880_v22 }
 0x289   : > { %373 = vxpose.xlu0.b32.start [1/2] (short) (narrow) %v357_v31, 8  ;;  %v360_v34 = vsel %vm336_vm2, %v357_v31, 0.0 }
 0x28a   : > { %v886_v32 = vpop.eup %885 }
 0x28b   : > { %v358_v33 = vmul.f32 %v886_v32, %v882_v24 }
 0x28d   : > { %374 = vxpose.xlu0.b32.end [2/2] (short) (narrow) %v358_v33, 8  ;;  %v361_v35 = vsel %vm336_vm2, %v358_v33, 0.0 }
 0x28e   : > { %v362_v36 = vadd.f32 %v361_v35, %v360_v34 }
 0x290   : > { %v363_v37 = vrot.slane %v362_v36, 4 }
 0x292   : > { %v364_v38 = vadd.f32 %v363_v37, %v362_v36 }
 0x294   : > { %v365_v39 = vrot.slane %v364_v38, 2 }
 0x296   : > { %v366_v40 = vadd.f32 %v365_v39, %v364_v38 }
 0x298   : > { %v367_v41 = vrot.slane %v366_v40, 1 }
 0x29a   : > { %v368_v43 = vadd.f32 %v367_v41, %v366_v40 }
 0x29c   : > { %v369_v44 = vadd.f32 %v368_v43, %v359_v42 }
 0x29e   : > { %371 = vst.msk [vmem:[#allocation3] sm:$0x1] %vm239_vm1, %v369_v44 }
 0x2a5   : > { %v484_v45 = vld [vmem:[#allocation3] sm:$0x1] }
 0x2a6   : > { %485 = vxpose.xlu1.b32.start.end [1/1] (short) (narrow) %v484_v45, 8 }
 0x2b6   : > { %878 = vset.pattern.permute.xlu0 %v1072_v49 }
 0x309   : > { %v389_v46 = vpop.trf.xlu0 }
 0x30a   : > { %770 = vmatmul.mubr.msk.f32.vlgmr.msra.gmra.mrb[0].mxu1 %vm405_vm4, %v389_v46 }
 0x30b   : > { %773 = vmatpush3.msk.msra.mxu1 %vm521_vm5, %v1071_v47  ;;  %774 = vmatprep.mubr.msk.f32.mxu1 %vm1070_vm3, %v1068_v0 }
 0x326   : > { %v501_v48 = vpop.trf.xlu1 }
 0x327   : > { %775 = vmatmul.mubr.msk.f32.vlgmr.msra.gmra.mrb[2].mxu1 %vm517_vm6, %v501_v48 }
 0x3dd   : > { %v475_v51 = vpop.f32.mrb[0].mxu1 }
 0x3de   : > { %v479_v52 = vadd.f32 %v475_v51, %v372_v50  ;;  %v771_v53 = vpop.f32.mrb[1].mxu1 }
 0x3e0   : > { %480 = vst.msk [vmem:[#allocation2] sm:$0xff] %vm237_vm0, %v479_v52 }
 0x3e7   : > { %v595_v58 = vld [vmem:[#allocation2] sm:$0xff] }
 0x3fa   : > { %v591_v54 = vpop.f32.mrb[2].mxu1 }
 0x3fb   : > { %598 = vperm.xlu0 %878, %v591_v54   ;;  %v776_v55 = vpop.f32.mrb[3].mxu1 }
 0x47a   : > { %v599_v56 = vpop.permute.xlu0 %598 }
 0x47b   : > { %887 = vrcp.f32 %v599_v56 }
 0x485   : > { %v888_v57 = vpop.eup %887 }
 0x486   : > { %v602_v59 = vmul.f32 %v888_v57, %v595_v58 }
 0x488   : > { %603 = vst.msk [vmem:[%s231_s24] sm:$0xff] %vm237_vm0, %v602_v59 }
 0x489   : > { %988 = shalt.err (!%p985_p11)
}
 0x48a   : > { %s989_s30 = scalar_lea.hbm %s1325_s9, 128  ;;  %s993_s5 = scalar_lea.hbm %s1378_s3, 256 }
 0x48b   : > { %p990_p0 = scmp.ne.s32.totalorder %s1325_s9, %s989_s30  ;;  %p994_p6 = scmp.lt.u32.totalorder %s1325_s9, %s1378_s3 }
 0x48c   : > { %p995_p7 = scmp.lt.u32.totalorder %s993_s5, %s989_s30  ;;  %p997_p8 = scmp.lt.u32.totalorder %s989_s30, %s1325_s9 }
 0x48d   : > { %p991_p4 = pnand %p990_p0, %p1393_p2 }
 0x48e   : > { %p996_p12 = por %p995_p7, %p994_p6 }
 0x48f   : > { %p992_p13 = pneg %p991_p4 }
 0x490   : > { %p998_p1 = por %p997_p8, %p996_p12 }
 0x492   : > { %p999_p10 = pnand %p998_p1, %p992_p13 }
 0x494   : > { %1002 = shalt.err (!%p999_p10)
}
 0x495   : > { %798 = dma.vmem_to_hbm [thread:$0]  (%p1393_p2), %s1327_s11, 128, %s1325_s9, %s605_s10  }
 0x496 PF: > { %s630_s20 = sand.u32 1, %s1041_s12   ;;  %p1394_p3 = scmp.ne.s32.totalorder %s1386_s23, 0 }
 0x497   : > { %p1395_p5 = scmp.ge.s32.totalorder %s1061_s17, 2  ;;  %s631_s22 = scalar_lea.sflag [#allocation6], %s630_s20 }
 0x499   : > { %p812_p9 = pnand %p1395_p5, %p1394_p3 }
 0x49b   : > { %1036 = dma.done.wait (!%p812_p9), %s631_s22, 128  }
 0x49c   : > { %1038 = vsyncadd (!%p812_p9), %s631_s22, 4294967168  ;;  %s20_s17 = sadd.s32 1, %s1061_s17   ;;  %s1396_s12 = smov %s1045_s13 }
 0x49d   : > { %p17_p11 = scmp.ge.s32.totalorder %s20_s17, 4   ;;  %s1397_s13 = smov %s1049_s14 }
 0x49e   : > { %s1398_s14 = smov %s1240_s6  ;;  %s1399_s15 = smov %s1057_s16 }
 0x49f   : > { %s1400_s16 = smov %s1402_s25  ;;  %19 = sbr.rel (!%p17_p11) target bundleno = 7 (0x7), region = 93 }
 0x4a6   :  { %636 = vsyncpa [#allocation5], 1 }
 0x4a7   :  { %638 = vsyncpa [#allocation5 + $0x1], 1 }
 0x4a8   :  { %639 = vsyncpa [#allocation8], 1 }
 0x4a9   :  { %640 = vsyncpa [#allocation6], 1 }
 0x4aa   :  { %642 = vsyncpa [#allocation6 + $0x1], 1 }

</bundles_post_ra>
